<compile_context>
chip_gen: v6e
topology: v6e:2x2x1
jax: 0.10.0
libtpu: 0.0.40
codegen_flags: <defaults>
</compile_context>

<pallas_src>
import functools

import jax
import jax.numpy as jnp
from jax import lax
from jax.experimental import pallas as pl
from jax.experimental.pallas import tpu as pltpu

_LANES = 128

_PASS_DTYPES = tuple(jnp.dtype(d) for d in (
    jnp.float32, jnp.bfloat16, jnp.float16,
    jnp.int8, jnp.uint8, jnp.int16, jnp.uint16, jnp.int32, jnp.uint32))


def _round_up(x, m):
    return (x + m - 1) // m * m


def _device_kind():
    try:
        return jax.devices()[0].device_kind.lower()
    except Exception:
        return ""


def _guess_num_cores(kind):
    # v4 / v5p (megacore) and v7x expose 2 TensorCores per device.
    if any(s in kind for s in ("v4", "v5p", "v7", "7x")):
        return 2
    return 1


def _prepare(a):
    """Flatten; keep native dtype (no HBM cast pass) whenever possible."""
    a = jnp.asarray(a)
    if a.dtype == jnp.bool_:
        a = a.astype(jnp.uint8)          # bool refs are awkward; rare case
    elif a.dtype not in _PASS_DTYPES:
        a = a.astype(jnp.float32)        # e.g. float64 under x64
    return a.reshape(-1)


def _to_f32(v):
    if jnp.issubdtype(v.dtype, jnp.integer):
        v = v.astype(jnp.int32)          # widest-supported int->float path
    return v.astype(jnp.float32)


def _bce_sum_kernel(x_ref, t_ref, o_ref, *, blk_cols, blocks_per_slice,
                    valid_cols, first_masked_blk, need_mask, hard_targets):
    pi = pl.program_id(0)
    j = pl.program_id(1)

    @pl.when(j == 0)
    def _init():
        o_ref[...] = jnp.zeros((1, 1, 1), jnp.float32)

    p = _to_f32(x_ref[...])
    t = _to_f32(t_ref[...])

    # PyTorch F.binary_cross_entropy clamps the log terms at -100.
    if hard_targets:
        # Binary (0/1) targets: one log per element, fewer VALU ops.
        pv = jnp.where(t >= 0.5, p, 1.0 - p)
        bce = -jnp.maximum(jnp.log(pv), jnp.float32(-100.0))
    else:
        log_p = jnp.maximum(jnp.log(p), jnp.float32(-100.0))
        log_1mp = jnp.maximum(jnp.log(1.0 - p), jnp.float32(-100.0))
        bce = -(t * log_p + (1.0 - t) * log_1mp)

    if need_mask:
        blk = pi * blocks_per_slice + j

        @pl.when(blk < first_masked_blk)          # interior: no mask work
        def _interior():
            o_ref[...] += jnp.sum(bce)

        @pl.when(blk >= first_masked_blk)         # ragged tail / clamped dup
        def _boundary():
            lane = lax.broadcasted_iota(jnp.int32, bce.shape, 1)
            valid = (blk * blk_cols + lane) < valid_cols
            # where(...) (not multiply) so garbage NaN/Inf in the partial
            # boundary block is dropped, not propagated.
            o_ref[...] += jnp.sum(jnp.where(valid, bce, jnp.float32(0.0)))
    else:
        o_ref[...] += jnp.sum(bce)


def focal_loss(inputs, targets, alpha=0.8, gamma=2.0, reduction="mean",
               hard_targets=False, num_parallel=None):
    """Focal loss on probability maps (any shape). Returns a scalar float32."""
    if reduction not in ("mean", "sum"):
        # TODO(synk): reduction='none' needs an elementwise-output kernel.
        raise NotImplementedError("reduction='none' is not implemented")

    x = _prepare(inputs)
    t = _prepare(targets)
    n = int(x.size)
    assert int(t.size) == n, "inputs/targets must have the same element count"
    if n == 0:
        return jnp.float32(0.0)

    # Copy-free 2-D view: (R, cols), R = largest power of two <= 8 dividing n.
    # A row-major reshape of a contiguous flat array is a bitcast (no HBM pass).
    R = 8
    while n % R:
        R //= 2
    cols = n // R

    kind = _device_kind()
    is_v7 = any(s in kind for s in ("v7", "7x"))
    target_block_bytes = (4 if is_v7 else 2) * 1024 * 1024   # per-input block
    # Physical VMEM of an (R<=8, blk_cols) f32 block is 8*blk_cols*4 bytes.
    blk_cols = max(_LANES, min(target_block_bytes // 32 // _LANES * _LANES,
                               _round_up(cols, _LANES)))
    nblocks = pl.cdiv(cols, blk_cols)

    n_par = num_parallel if num_parallel is not None else _guess_num_cores(kind)
    n_par = max(1, min(int(n_par), nblocks))
    blocks_per_slice = pl.cdiv(nblocks, n_par)

    need_mask = (cols % blk_cols != 0) or (n_par * blocks_per_slice != nblocks)
    first_masked_blk = cols // blk_cols   # blocks below this are fully valid

    kernel = functools.partial(
        _bce_sum_kernel, blk_cols=blk_cols, blocks_per_slice=blocks_per_slice,
        valid_cols=cols, first_masked_blk=first_masked_blk,
        need_mask=need_mask, hard_targets=bool(hard_targets))

    def in_map(pi, j):
        blk = pi * blocks_per_slice + j
        # Clamp logical blocks past the end onto a valid block; their
        # contribution is zeroed by the in-kernel boundary mask.
        return (0, jnp.minimum(blk, nblocks - 1))

    partials = pl.pallas_call(
        kernel,
        out_shape=jax.ShapeDtypeStruct((n_par, 1, 1), jnp.float32),
        grid_spec=pltpu.PrefetchScalarGridSpec(
            num_scalar_prefetch=0,
            grid=(n_par, blocks_per_slice),
            in_specs=[
                pl.BlockSpec((R, blk_cols), in_map),
                pl.BlockSpec((R, blk_cols), in_map),
            ],
            out_specs=pl.BlockSpec((1, 1, 1), lambda pi, j: (pi, 0, 0)),
        ),
        compiler_params=pltpu.CompilerParams(
            dimension_semantics=("parallel", "arbitrary"),
            # Generation-safe: < v7x's 64 MiB physical VMEM, plenty on v5e/v6e.
            vmem_limit_bytes=48 * 1024 * 1024,
        ),
    )(x.reshape(R, cols), t.reshape(R, cols))

    total = jnp.sum(partials)
    bce = total if reduction == "sum" else total / jnp.float32(n)
    bce_exp = jnp.exp(-bce)
    loss = jnp.float32(alpha) * (1.0 - bce_exp) ** jnp.float32(gamma) * bce
    return loss.astype(jnp.float32)


class FocalLoss:
    """Thin wrapper mirroring the PyTorch module's interface."""

    def __init__(self, alpha=0.8, gamma=2, reduction="mean"):
        self.alpha, self.gamma, self.reduction = alpha, gamma, reduction

    def __call__(self, inputs, targets, **kwargs):
        return focal_loss(inputs, targets, alpha=self.alpha, gamma=self.gamma,
                          reduction=self.reduction, **kwargs)


def focal_loss_ref(inputs, targets, alpha=0.8, gamma=2.0):
    p = inputs.astype(jnp.float32)
    t = targets.astype(jnp.float32)
    log_p = jnp.maximum(jnp.log(p), -100.0)
    log_1mp = jnp.maximum(jnp.log(1.0 - p), -100.0)
    bce = jnp.mean(-(t * log_p + (1.0 - t) * log_1mp))
    return alpha * (1.0 - jnp.exp(-bce)) ** gamma * bce


if __name__ == "__main__":
    key = jax.random.PRNGKey(0)
    k1, k2, k3, k4 = jax.random.split(key, 4)

    # Primary check: NCHW probability maps (lane-aligned fast path, no copies).
    shape = (2, 4, 16, 16)
    inputs = jax.nn.sigmoid(jax.random.normal(k1, shape, jnp.float32))
    targets = (jax.random.uniform(k2, shape) > 0.5).astype(jnp.float32)
    ref = focal_loss_ref(inputs, targets)

    out = jax.block_until_ready(FocalLoss()(inputs, targets))
    assert jnp.allclose(out, ref, rtol=1e-5, atol=1e-6), (out, ref)

    # hard-target (single-log) fast path: identical for 0/1 targets.
    out_h = jax.block_until_ready(focal_loss(inputs, targets, hard_targets=True))
    assert jnp.allclose(out_h, ref, rtol=1e-5, atol=1e-6), (out_h, ref)

    # uint8 targets streamed natively and cast to f32 inside the kernel.
    out_u8 = jax.block_until_ready(focal_loss(inputs, targets.astype(jnp.uint8)))
    assert jnp.allclose(out_u8, ref, rtol=1e-5, atol=1e-6), (out_u8, ref)

    # Ragged element count (n % 128 != 0): no wrapper-side pad, boundary block
    # masked in-kernel.
    shape2 = (2, 3, 15, 17)
    inputs2 = jax.nn.sigmoid(jax.random.normal(k3, shape2, jnp.float32))
    targets2 = (jax.random.uniform(k4, shape2) > 0.5).astype(jnp.float32)
    out2 = jax.block_until_ready(focal_loss(inputs2, targets2))
    ref2 = focal_loss_ref(inputs2, targets2)
    assert jnp.allclose(out2, ref2, rtol=1e-5, atol=1e-6), (out2, ref2)

    print("KERNEL_OK")
</pallas_src>

<mosaic_0001>
module attributes {stable_mosaic.version = 11 : i64} {
  func.func @_bce_sum_kernel(%arg0: i32, %arg1: i32, %arg2: memref<8x256xf32, #tpu.memory_space<vmem>>, %arg3: memref<8x256xf32, #tpu.memory_space<vmem>>, %arg4: memref<1x1x1xf32, #tpu.memory_space<vmem>>) attributes {dimension_semantics = [#tpu.dimension_semantics<parallel>, #tpu.dimension_semantics<arbitrary>], iteration_bounds = array<i64: 1, 1>, scalar_prefetch = 0 : i64, scratch_operands = 0 : i64, tpu.core_type = #tpu.core_type<tc>, window_params = [{transform_indices = @transform_0, window_bounds = array<i64: 8, 256>}, {transform_indices = @transform_1, window_bounds = array<i64: 8, 256>}, {transform_indices = @transform_2, window_bounds = array<i64: 1, 1, 1>}]} {
    %c0_i32 = arith.constant 0 : i32
    %0 = arith.cmpi eq, %arg1, %c0_i32 : i32
    %1 = arith.extui %0 : i1 to i32
    %c0_i32_0 = arith.constant 0 : i32
    %2 = arith.cmpi ne, %1, %c0_i32_0 : i32
    scf.if %2 {
      %cst_15 = arith.constant 0.000000e+00 : f32
      %28 = vector.broadcast %cst_15 : f32 to vector<1x1x1xf32>
      %c0_16 = arith.constant 0 : index
      %c0_17 = arith.constant 0 : index
      %c0_18 = arith.constant 0 : index
      %29 = vector.load %arg4[%c0_16, %c0_17, %c0_18] : memref<1x1x1xf32, #tpu.memory_space<vmem>>, vector<1x1x1xf32>
      tpu.vector_store %arg4[%c0_16, %c0_17, %c0_18], %28 {strides = array<i32>} : memref<1x1x1xf32, #tpu.memory_space<vmem>>, vector<1x1x1xf32>,
    } else {
    }
    %c0 = arith.constant 0 : index
    %c0_1 = arith.constant 0 : index
    %3 = vector.load %arg2[%c0, %c0_1] : memref<8x256xf32, #tpu.memory_space<vmem>>, vector<8x256xf32>
    %c0_2 = arith.constant 0 : index
    %c0_3 = arith.constant 0 : index
    %4 = vector.load %arg3[%c0_2, %c0_3] : memref<8x256xf32, #tpu.memory_space<vmem>>, vector<8x256xf32>
    %5 = math.log %3 : vector<8x256xf32>
    %cst = arith.constant -1.000000e+02 : f32
    %6 = vector.broadcast %cst : f32 to vector<8x256xf32>
    %7 = arith.maximumf %5, %6 : vector<8x256xf32>
    %cst_4 = arith.constant 1.000000e+00 : f32
    %8 = vector.broadcast %cst_4 : f32 to vector<8x256xf32>
    %9 = arith.subf %8, %3 : vector<8x256xf32>
    %10 = math.log %9 : vector<8x256xf32>
    %cst_5 = arith.constant -1.000000e+02 : f32
    %11 = vector.broadcast %cst_5 : f32 to vector<8x256xf32>
    %12 = arith.maximumf %10, %11 : vector<8x256xf32>
    %13 = arith.mulf %4, %7 : vector<8x256xf32>
    %cst_6 = arith.constant 1.000000e+00 : f32
    %14 = vector.broadcast %cst_6 : f32 to vector<8x256xf32>
    %15 = arith.subf %14, %4 : vector<8x256xf32>
    %16 = arith.mulf %15, %12 : vector<8x256xf32>
    %17 = arith.addf %13, %16 : vector<8x256xf32>
    %cst_7 = arith.constant 0.000000e+00 : f32
    %18 = vector.broadcast %cst_7 : f32 to vector<8x256xf32>
    %19 = arith.subf %18, %17 : vector<8x256xf32>
    %c0_8 = arith.constant 0 : index
    %c0_9 = arith.constant 0 : index
    %c0_10 = arith.constant 0 : index
    %20 = vector.load %arg4[%c0_8, %c0_9, %c0_10] : memref<1x1x1xf32, #tpu.memory_space<vmem>>, vector<1x1x1xf32>
    %21 = vector.shape_cast %19 : vector<8x256xf32> to vector<1x8x256xf32>
    %cst_11 = arith.constant dense<0.000000e+00> : vector<1xf32>
    %22 = vector.multi_reduction <add>, %21, %cst_11 [1, 2] : vector<1x8x256xf32> to vector<1xf32>
    %23 = vector.shape_cast %22 : vector<1xf32> to vector<1x1x1xf32>
    %24 = vector.extract %23[0, 0, 0] : f32 from vector<1x1x1xf32>
    %25 = vector.broadcast %24 : f32 to vector<1x1x1xf32>
    %26 = arith.addf %20, %25 : vector<1x1x1xf32>
    %c0_12 = arith.constant 0 : index
    %c0_13 = arith.constant 0 : index
    %c0_14 = arith.constant 0 : index
    %27 = vector.load %arg4[%c0_12, %c0_13, %c0_14] : memref<1x1x1xf32, #tpu.memory_space<vmem>>, vector<1x1x1xf32>
    tpu.vector_store %arg4[%c0_12, %c0_13, %c0_14], %26 {strides = array<i32>} : memref<1x1x1xf32, #tpu.memory_space<vmem>>, vector<1x1x1xf32>,
    return
  }
  func.func @transform_0(%arg0: i32, %arg1: i32) -> (i32, i32) {
    %c1_i32 = arith.constant 1 : i32
    %0 = arith.muli %arg0, %c1_i32 : i32
    %1 = arith.addi %0, %arg1 : i32
    %c0_i32 = arith.constant 0 : i32
    %2 = arith.minsi %1, %c0_i32 : i32
    %c0_i32_0 = arith.constant 0 : i32
    %c0_i32_1 = arith.constant 0 : i32
    return %c0_i32_0, %2 : i32, i32
  }
  func.func @transform_1(%arg0: i32, %arg1: i32) -> (i32, i32) {
    %c1_i32 = arith.constant 1 : i32
    %0 = arith.muli %arg0, %c1_i32 : i32
    %1 = arith.addi %0, %arg1 : i32
    %c0_i32 = arith.constant 0 : i32
    %2 = arith.minsi %1, %c0_i32 : i32
    %c0_i32_0 = arith.constant 0 : i32
    %c0_i32_1 = arith.constant 0 : i32
    return %c0_i32_0, %2 : i32, i32
  }
  func.func @transform_2(%arg0: i32, %arg1: i32) -> (i32, i32, i32) {
    %c0_i32 = arith.constant 0 : i32
    %c0_i32_0 = arith.constant 0 : i32
    %c0_i32_1 = arith.constant 0 : i32
    return %arg0, %c0_i32, %c0_i32_0 : i32, i32, i32
  }
}

</mosaic_0001>

<bundles_post_ra>
// kernel: tpu_custom_call.1
= control target key start
LH: loop header
LB: loop body
LE: loop exit
PB: predicated region body
PF: predicated region fallthrough
CT: control target
= control target key end

     0   :  { %7 = vsyncpa [#allocation3], 0  ;;  %s235_s0 = inlined_call_operand.hbm [shape: f32[8,256], index: 0, kind: input, shape index: {}]   ;;  %s236_s1 = inlined_call_operand.hbm [shape: f32[8,256], index: 1, kind: input, shape index: {}]   ;;  %s237_s2 = inlined_call_operand.hbm [shape: f32[1,1,1], index: 2, kind: output, shape index: {}]  }
   0x1   :  { %8 = vsyncpa [#allocation6], 0 }
   0x2   :  { %9 = vsyncpa [#allocation4], 0  ;;  %s205_s9 = smov [#allocation2]   ;;  %s206_s11 = smov [#allocation5]  }
   0x3   :  { %s22_s10 = sshll.u32 %s205_s9, 4  ;;  %s38_s12 = sshll.u32 %s206_s11, 4  ;;  %s23_s10 = int_to_ptr.vmem [resolvable:$true] %s22_s10  ;;  %s39_s12 = int_to_ptr.vmem [resolvable:$true] %s38_s12 }
   0x4   :  { %s147_s13 = scalar_lea.vmem %s23_s10, 256  ;;  %p152_p1 = scmp.lt.s32.totalorder %s23_s10, %s23_s10 }
   0x5   :  { %p148_p0 = scmp.ne.s32.totalorder %s23_s10, %s147_s13  ;;  %p153_p2 = scmp.lt.s32.totalorder %s147_s13, %s147_s13 }
   0x7   :  { %p154_p3 = por %p153_p2, %p152_p1 }
   0x9   :  { %p155_p4 = pnand %p154_p3, %p148_p0 }
   0xb   :  { %158 = shalt.err (!%p155_p4)
}
   0xc   :  { %25 = dma.hbm_to_vmem [thread:$0]  %s235_s0, 256, %s23_s10, [#allocation3]  }
   0xd   :  { %s167_s16 = scalar_lea.vmem %s39_s12, 256  ;;  %p172_p6 = scmp.lt.s32.totalorder %s39_s12, %s39_s12 }
   0xe   :  { %p168_p5 = scmp.ne.s32.totalorder %s39_s12, %s167_s16  ;;  %p173_p7 = scmp.lt.s32.totalorder %s167_s16, %s167_s16 }
  0x10   :  { %p174_p8 = por %p173_p7, %p172_p6 }
  0x12   :  { %p175_p9 = pnand %p174_p8, %p168_p5 }
  0x14   :  { %178 = shalt.err (!%p175_p9)
}
  0x15   :  { %41 = dma.hbm_to_vmem [thread:$0]  %s236_s1, 256, %s39_s12, [#allocation6]  }
  0x16   :  { %199 = dma.done.wait [#allocation3], 256  }
  0x17   :  { %200 = vsyncadd [#allocation3], 4294967040 }
  0x18   :  { %201 = dma.done.wait [#allocation6], 256  }
  0x19   :  { %202 = vsyncadd [#allocation6], 4294967040  ;;  %vm60_vm0 = vcmask 0   ;;  %v207_v0 = vmov 0.0   ;;  %v62_v1 = vld [vmem:[#allocation2] sm:$0xff]  ;;  %v63_v2 = vld [vmem:[#allocation2 + $0x8] sm:$0xff] }
  0x1a   :  { %61 = vst.msk [vmem:[#allocation7] sm:$0x1] %vm60_vm0, %v207_v0  ;;  %131 = vlog2.f32 %v62_v1  ;;  %v72_v3 = vsub.f32 1.0, %v62_v1  ;;  %v73_v4 = vsub.f32 1.0, %v63_v2  ;;  %v64_v6 = vld [vmem:[#allocation5] sm:$0xff]  ;;  %v65_v8 = vld [vmem:[#allocation5 + $0x8] sm:$0xff] }
  0x1b   :  { %133 = vlog2.f32 %v63_v2  ;;  %v82_v15 = vsub.f32 1.0, %v64_v6  ;;  %v83_v18 = vsub.f32 1.0, %v65_v8  ;;  %s208_s0 = smov [#allocation7]  }
  0x1c   :  { %135 = vlog2.f32 %v72_v3  ;;  %s111_s1 = sshll.u32 %s208_s0, 4  ;;  %s112_s1 = int_to_ptr.vmem [resolvable:$true] %s111_s1 }
  0x1d   :  { %137 = vlog2.f32 %v73_v4  ;;  %s179_s20 = scalar_lea.vmem %s112_s1, 16  ;;  %s183_s21 = scalar_lea.vmem %s112_s1, 32 }
  0x1e   :  { %p180_p10 = scmp.ne.s32.totalorder %s112_s1, %s179_s20  ;;  %p184_p11 = scmp.lt.s32.totalorder %s112_s1, %s112_s1 }
  0x1f   :  { %p185_p12 = scmp.lt.s32.totalorder %s183_s21, %s179_s20 }
  0x21   :  { %v90_v37 = vld [vmem:[#allocation7] sm:$0x1]  ;;  %p186_p13 = por %p185_p12, %p184_p11 }
  0x23   :  { %p187_p0 = pnand %p186_p13, %p180_p10 }
  0x27   :  { %v132_v5 = vpop.eup %131 }
  0x28   :  { %v134_v7 = vpop.eup %133  ;;  %v67_v9 = vmul.f32 0.6931472, %v132_v5 }
  0x29   :  { %v136_v10 = vpop.eup %135  ;;  %v69_v11 = vmul.f32 0.6931472, %v134_v7 }
  0x2a   :  { %v138_v12 = vpop.eup %137  ;;  %v70_v13 = vmax.f32 %v67_v9, -100.0  ;;  %v75_v14 = vmul.f32 0.6931472, %v136_v10 }
  0x2b   :  { %v71_v16 = vmax.f32 %v69_v11, -100.0  ;;  %v77_v17 = vmul.f32 0.6931472, %v138_v12 }
  0x2c   :  { %v78_v19 = vmax.f32 %v75_v14, -100.0  ;;  %v80_v20 = vmul.f32 %v70_v13, %v64_v6 }
  0x2d   :  { %v79_v21 = vmax.f32 %v77_v17, -100.0  ;;  %v81_v22 = vmul.f32 %v71_v16, %v65_v8 }
  0x2e   :  { %v84_v23 = vmul.f32 %v82_v15, %v78_v19 }
  0x2f   :  { %v85_v24 = vmul.f32 %v83_v18, %v79_v21 }
  0x30   :  { %v86_v25 = vadd.f32 %v84_v23, %v80_v20 }
  0x31   :  { %v87_v26 = vadd.f32 %v85_v24, %v81_v22 }
  0x32   :  { %v88_v27 = vsub.f32 0.0, %v86_v25 }
  0x33   :  { %v89_v28 = vsub.f32 0.0, %v87_v26 }
  0x35   :  { %v91_v29 = vadd.f32 %v89_v28, %v88_v27 }
  0x37   :  { %92 = vadd.xlane.f32.xlu0 %v91_v29 }
  0xc0   :  { %v93_v30 = vpop.xlane.xlu0 %92 }
  0xc1   :  { %v94_v31 = vrot.slane %v93_v30, 4 }
  0xc3   :  { %v95_v32 = vadd.f32 %v94_v31, %v93_v30 }
  0xc5   :  { %v96_v33 = vrot.slane %v95_v32, 2 }
  0xc7   :  { %v97_v34 = vadd.f32 %v96_v33, %v95_v32 }
  0xc9   :  { %v98_v35 = vrot.slane %v97_v34, 1 }
  0xcb   :  { %v99_v36 = vadd.f32 %v98_v35, %v97_v34 }
  0xcd   :  { %125 = vpush %v99_v36 }
  0xfe   :  { %s126_s19 = spop %125 }
  0xff   :  { %v101_v38 = vstv %s126_s19 }
 0x100   :  { %v102_v39 = vadd.f32 %v101_v38, %v90_v37 }
 0x102   :  { %104 = vst.msk [vmem:[#allocation7] sm:$0x1] %vm60_vm0, %v102_v39 }
 0x103   :  { %190 = shalt.err (!%p187_p0)
}
 0x104   :  { %114 = dma.vmem_to_hbm [thread:$0]  %s112_s1, 16, %s237_s2, [#allocation4]  }
 0x105   :  { %203 = dma.done.wait [#allocation4], 16  }
 0x106   :  { %204 = vsyncadd [#allocation4], 4294967280 }
 0x107   :  { %118 = vsyncpa [#allocation3], 1 }
 0x108   :  { %119 = vsyncpa [#allocation6], 1 }
 0x109   :  { %120 = vsyncpa [#allocation4], 1 }

</bundles_post_ra>
